<compile_context>
chip_gen: v5e
topology: v5e:2x2
jax: 0.10.0
libtpu: 0.0.40
codegen_flags: <defaults>
</compile_context>

<pallas_src>
import functools

import jax
import jax.numpy as jnp
from jax.experimental import pallas as pl
from jax.experimental.pallas import tpu as pltpu


# ---------------------------------------------------------------------------
# Kernel
# ---------------------------------------------------------------------------
def mlp_kernel(x_ref, w1_ref, b1_ref, w2_ref, b2_ref, w3_ref, b3_ref, o_ref):
    # x tile: [TB, Din_pad] f32 (cast to bf16 in-kernel); weights bf16; biases f32.
    x = x_ref[...].astype(jnp.bfloat16)

    # Layer 1: Linear (bf16 MXU, f32 acc) + bias + ReLU  (dropout == identity in eval)
    h1 = jnp.dot(x, w1_ref[...], preferred_element_type=jnp.float32) + b1_ref[...]
    h1 = jnp.maximum(h1, 0.0).astype(jnp.bfloat16)   # eager bf16: smaller live intermediate

    # Layer 2: Linear + bias + ReLU
    h2 = jnp.dot(h1, w2_ref[...], preferred_element_type=jnp.float32) + b2_ref[...]
    h2 = jnp.maximum(h2, 0.0).astype(jnp.bfloat16)

    # Layer 3: Linear (output head)
    out = jnp.dot(h2, w3_ref[...], preferred_element_type=jnp.float32) + b3_ref[...]
    o_ref[...] = out.astype(o_ref.dtype)


# ---------------------------------------------------------------------------
# Sizing helpers
# ---------------------------------------------------------------------------
_LANE = 128
_BATCH_ALIGN = 16            # bf16 sublane packing: one bf16 vreg holds [16, 128]
_MIB = 1024 * 1024


def _round_up(n, m):
    return ((n + m - 1) // m) * m


def _vmem_budget_bytes():
    """Per-generation VMEM budget: physical capacity minus headroom."""
    cap = 64 * _MIB  # conservative fallback (v7x per-core physical VMEM)
    try:
        info = pltpu.get_tpu_info()
        cap = int(getattr(info, "vmem_capacity_bytes", cap)) or cap
    except Exception:
        pass
    # Leave 16 MiB headroom for compiler-internal scratch; never go below 32 MiB.
    return max(32 * _MIB, cap - 16 * _MIB)


_VMEM_BUDGET_BYTES = _vmem_budget_bytes()


def _pick_batch_tile(din_p, h_p, dout_p, budget_bytes):
    """Largest 16-aligned batch tile whose working set fits the VMEM budget.

    Pallas double-buffers every input by default, including the constant-index
    weight/bias blocks, so the 'resident' set is counted twice.
    """
    resident = 2 * (
        2 * (din_p * h_p + h_p * h_p + h_p * dout_p)   # bf16 weights
        + 4 * (2 * h_p + dout_p)                       # f32 biases
    )
    for tb in (2048, 1024, 512, 256, 128, 64, 32, 16):
        per_tile = 2 * tb * din_p * 4       # double-buffered f32 x tiles
        per_tile += 2 * tb * dout_p * 4     # double-buffered f32 out tiles
        per_tile += tb * din_p * 2          # in-kernel bf16 copy of x
        per_tile += tb * h_p * (4 + 2)      # live f32 dot result + bf16 intermediate
        if resident + per_tile <= budget_bytes:
            return tb
    # TODO(synk): fall back to a K/N-tiled grid with a VMEM f32 accumulator
    #             (pl.when init/finalize, reduction axis "arbitrary") instead
    #             of failing when the weight set alone exceeds VMEM.
    raise ValueError(
        "MLP weight set does not fit the VMEM-resident schedule "
        f"(resident~{resident / _MIB:.1f} MiB, budget {budget_bytes / _MIB:.1f} MiB); "
        "K-tiled fallback not implemented."
    )


def _pad2d(a, rows, cols):
    r, c = a.shape
    if r == rows and c == cols:
        return a
    return jnp.pad(a, ((0, rows - r), (0, cols - c)))


# ---------------------------------------------------------------------------
# Params
# ---------------------------------------------------------------------------
def init_mlp_params(key, input_dim, hidden_dim, output_dim):
    """Matches nn.Linear's default U(-1/sqrt(fan_in), 1/sqrt(fan_in)).
    Weights are stored transposed: [in_features, out_features]."""
    def linear(k, fan_in, fan_out):
        kw, kb = jax.random.split(k)
        bound = 1.0 / jnp.sqrt(fan_in)
        w = jax.random.uniform(kw, (fan_in, fan_out), jnp.float32, -bound, bound)
        b = jax.random.uniform(kb, (1, fan_out), jnp.float32, -bound, bound)
        return w, b

    k1, k2, k3 = jax.random.split(key, 3)
    w1, b1 = linear(k1, input_dim, hidden_dim)
    w2, b2 = linear(k2, hidden_dim, hidden_dim)
    w3, b3 = linear(k3, hidden_dim, output_dim)
    return {"w1": w1, "b1": b1, "w2": w2, "b2": b2, "w3": w3, "b3": b3}


def prepare_params(params):
    """One-time pad (lane-dense, multiple of 128) + cast (weights bf16, biases f32).

    Done once at init so the per-call forward pays no weight pad/cast HBM pass.
    """
    w1, b1 = params["w1"], params["b1"]
    w2, b2 = params["w2"], params["b2"]
    w3, b3 = params["w3"], params["b3"]
    din, h = w1.shape
    dout = w3.shape[1]
    din_p = _round_up(din, _LANE)
    h_p = _round_up(h, _LANE)
    dout_p = _round_up(dout, _LANE)
    return {
        "w1": _pad2d(w1, din_p, h_p).astype(jnp.bfloat16),
        "b1": _pad2d(b1, 1, h_p).astype(jnp.float32),
        "w2": _pad2d(w2, h_p, h_p).astype(jnp.bfloat16),
        "b2": _pad2d(b2, 1, h_p).astype(jnp.float32),
        "w3": _pad2d(w3, h_p, dout_p).astype(jnp.bfloat16),
        "b3": _pad2d(b3, 1, dout_p).astype(jnp.float32),
    }


# ---------------------------------------------------------------------------
# Forward
# ---------------------------------------------------------------------------
@functools.partial(jax.jit, static_argnames=("out_dim",))
def mlp_forward(x, prepared, *, out_dim):
    """x: [B, input_dim] float32. prepared: dict from prepare_params()."""
    w1, b1 = prepared["w1"], prepared["b1"]
    w2, b2 = prepared["w2"], prepared["b2"]
    w3, b3 = prepared["w3"], prepared["b3"]

    B, din = x.shape
    din_p, h_p = w1.shape
    dout_p = w3.shape[1]
    assert din <= din_p, "input dim larger than prepared weights"

    tb = _pick_batch_tile(din_p, h_p, dout_p, _VMEM_BUDGET_BYTES)
    tb = min(tb, _round_up(B, _BATCH_ALIGN))   # don't over-pad tiny batches
    b_p = _round_up(B, tb)
    n_tiles = b_p // tb

    # Pad x only if needed; keep it f32 (cast to bf16 inside the kernel) so there
    # is no extra wrapper-side cast pass over the activations.
    x_p = _pad2d(x, b_p, din_p)

    # Advisory cost estimate for XLA's surrounding schedule.
    flops = 2 * b_p * (din_p * h_p + h_p * h_p + h_p * dout_p)
    bytes_accessed = (
        x_p.size * 4
        + (w1.size + w2.size + w3.size) * 2
        + (b1.size + b2.size + b3.size) * 4
        + b_p * dout_p * 4
    )
    cost = pl.CostEstimate(flops=flops, transcendentals=0,
                           bytes_accessed=bytes_accessed)

    grid_spec = pltpu.PrefetchScalarGridSpec(
        num_scalar_prefetch=0,
        grid=(n_tiles,),
        in_specs=[
            # Batch-tiled activations (double-buffered across the grid).
            pl.BlockSpec((tb, din_p), lambda i: (i, 0)),
            # Weights + biases: constant block index -> VMEM-resident, DMA'd once.
            pl.BlockSpec((din_p, h_p), lambda i: (0, 0)),
            pl.BlockSpec((1, h_p), lambda i: (0, 0)),
            pl.BlockSpec((h_p, h_p), lambda i: (0, 0)),
            pl.BlockSpec((1, h_p), lambda i: (0, 0)),
            pl.BlockSpec((h_p, dout_p), lambda i: (0, 0)),
            pl.BlockSpec((1, dout_p), lambda i: (0, 0)),
        ],
        out_specs=pl.BlockSpec((tb, dout_p), lambda i: (i, 0)),
    )

    # Megacore-shard the batch axis only when the grid is long enough to be
    # worth the duplicate per-core weight DMA (v7x has 2 TCs).
    dim_sem = ("parallel",) if n_tiles >= 4 else ("arbitrary",)

    # Output kept f32 to match the PyTorch module; switch to bf16 here if the
    # consumer accepts it (halves output HBM writeback on mem-bound shapes).
    out_p = pl.pallas_call(
        mlp_kernel,
        out_shape=jax.ShapeDtypeStruct((b_p, dout_p), jnp.float32),
        grid_spec=grid_spec,
        compiler_params=pltpu.CompilerParams(
            dimension_semantics=dim_sem,
            vmem_limit_bytes=_VMEM_BUDGET_BYTES + 8 * _MIB,
        ),
        cost_estimate=cost,
    )(x_p, w1, b1, w2, b2, w3, b3)

    # Strip batch / feature padding.
    return out_p[:B, :out_dim]


# ---------------------------------------------------------------------------
# Reference
# ---------------------------------------------------------------------------
def mlp_reference(x, params):
    h1 = jnp.maximum(x @ params["w1"] + params["b1"], 0.0)
    h2 = jnp.maximum(h1 @ params["w2"] + params["b2"], 0.0)
    return h2 @ params["w3"] + params["b3"]


if __name__ == "__main__":
    key = jax.random.PRNGKey(0)
    k_x, k_p = jax.random.split(key)

    batch, input_dim, hidden_dim, output_dim = 2, 16, 32, 8

    x = jax.random.normal(k_x, (batch, input_dim), jnp.float32)
    params = init_mlp_params(k_p, input_dim, hidden_dim, output_dim)
    prepared = prepare_params(params)   # one-time pad + bf16 cast (not per call)

    out = mlp_forward(x, prepared, out_dim=output_dim)
    out = jax.block_until_ready(out)

    ref = mlp_reference(x, params)
    assert out.shape == (batch, output_dim), f"bad shape {out.shape}"
    # Kernel uses bf16 operands (f32 accumulation) -> looser tolerance vs f32 ref.
    assert jnp.allclose(out, ref, atol=3e-2, rtol=3e-2), "mismatch vs reference"

    print("KERNEL_OK")
</pallas_src>

<mosaic_0001>
module attributes {stable_mosaic.version = 11 : i64} {
  func.func @mlp_kernel(%arg0: i32, %arg1: memref<16x128xf32, #tpu.memory_space<vmem>>, %arg2: memref<128x128xbf16, #tpu.memory_space<vmem>>, %arg3: memref<1x128xf32, #tpu.memory_space<vmem>>, %arg4: memref<128x128xbf16, #tpu.memory_space<vmem>>, %arg5: memref<1x128xf32, #tpu.memory_space<vmem>>, %arg6: memref<128x128xbf16, #tpu.memory_space<vmem>>, %arg7: memref<1x128xf32, #tpu.memory_space<vmem>>, %arg8: memref<16x128xf32, #tpu.memory_space<vmem>>) attributes {dimension_semantics = [#tpu.dimension_semantics<arbitrary>], iteration_bounds = array<i64: 1>, scalar_prefetch = 0 : i64, scratch_operands = 0 : i64, tpu.core_type = #tpu.core_type<tc>, window_params = [{transform_indices = @transform_0, window_bounds = array<i64: 16, 128>}, {pipeline_mode = #tpu.pipeline_mode<synchronous>, transform_indices = @transform_1, window_bounds = array<i64: 128, 128>}, {pipeline_mode = #tpu.pipeline_mode<synchronous>, transform_indices = @transform_2, window_bounds = array<i64: 1, 128>}, {pipeline_mode = #tpu.pipeline_mode<synchronous>, transform_indices = @transform_3, window_bounds = array<i64: 128, 128>}, {pipeline_mode = #tpu.pipeline_mode<synchronous>, transform_indices = @transform_4, window_bounds = array<i64: 1, 128>}, {pipeline_mode = #tpu.pipeline_mode<synchronous>, transform_indices = @transform_5, window_bounds = array<i64: 128, 128>}, {pipeline_mode = #tpu.pipeline_mode<synchronous>, transform_indices = @transform_6, window_bounds = array<i64: 1, 128>}, {transform_indices = @transform_7, window_bounds = array<i64: 16, 128>}]} {
    %c0 = arith.constant 0 : index
    %c0_0 = arith.constant 0 : index
    %0 = vector.load %arg1[%c0, %c0_0] : memref<16x128xf32, #tpu.memory_space<vmem>>, vector<16x128xf32>
    %1 = arith.truncf %0 : vector<16x128xf32> to vector<16x128xbf16>
    %c0_1 = arith.constant 0 : index
    %c0_2 = arith.constant 0 : index
    %2 = vector.load %arg2[%c0_1, %c0_2] : memref<128x128xbf16, #tpu.memory_space<vmem>>, vector<128x128xbf16>
    %cst = arith.constant dense<0.000000e+00> : vector<16x128xf32>
    %3 = tpu.matmul %1, %2, %cst {dimension_numbers = #tpu.dot_dimension_numbers<[1], [0], [0], [1], [0, 0, 1, 1], [], []>} : vector<16x128xbf16>, vector<128x128xbf16>, vector<16x128xf32> -> vector<16x128xf32>
    %c0_3 = arith.constant 0 : index
    %c0_4 = arith.constant 0 : index
    %4 = vector.load %arg3[%c0_3, %c0_4] : memref<1x128xf32, #tpu.memory_space<vmem>>, vector<1x128xf32>
    %5 = vector.broadcast %4 : vector<1x128xf32> to vector<16x128xf32>
    %6 = arith.addf %3, %5 : vector<16x128xf32>
    %cst_5 = arith.constant 0.000000e+00 : f32
    %7 = vector.broadcast %cst_5 : f32 to vector<16x128xf32>
    %8 = arith.maximumf %6, %7 : vector<16x128xf32>
    %9 = arith.truncf %8 : vector<16x128xf32> to vector<16x128xbf16>
    %c0_6 = arith.constant 0 : index
    %c0_7 = arith.constant 0 : index
    %10 = vector.load %arg4[%c0_6, %c0_7] : memref<128x128xbf16, #tpu.memory_space<vmem>>, vector<128x128xbf16>
    %cst_8 = arith.constant dense<0.000000e+00> : vector<16x128xf32>
    %11 = tpu.matmul %9, %10, %cst_8 {dimension_numbers = #tpu.dot_dimension_numbers<[1], [0], [0], [1], [0, 0, 1, 1], [], []>} : vector<16x128xbf16>, vector<128x128xbf16>, vector<16x128xf32> -> vector<16x128xf32>
    %c0_9 = arith.constant 0 : index
    %c0_10 = arith.constant 0 : index
    %12 = vector.load %arg5[%c0_9, %c0_10] : memref<1x128xf32, #tpu.memory_space<vmem>>, vector<1x128xf32>
    %13 = vector.broadcast %12 : vector<1x128xf32> to vector<16x128xf32>
    %14 = arith.addf %11, %13 : vector<16x128xf32>
    %cst_11 = arith.constant 0.000000e+00 : f32
    %15 = vector.broadcast %cst_11 : f32 to vector<16x128xf32>
    %16 = arith.maximumf %14, %15 : vector<16x128xf32>
    %17 = arith.truncf %16 : vector<16x128xf32> to vector<16x128xbf16>
    %c0_12 = arith.constant 0 : index
    %c0_13 = arith.constant 0 : index
    %18 = vector.load %arg6[%c0_12, %c0_13] : memref<128x128xbf16, #tpu.memory_space<vmem>>, vector<128x128xbf16>
    %cst_14 = arith.constant dense<0.000000e+00> : vector<16x128xf32>
    %19 = tpu.matmul %17, %18, %cst_14 {dimension_numbers = #tpu.dot_dimension_numbers<[1], [0], [0], [1], [0, 0, 1, 1], [], []>} : vector<16x128xbf16>, vector<128x128xbf16>, vector<16x128xf32> -> vector<16x128xf32>
    %c0_15 = arith.constant 0 : index
    %c0_16 = arith.constant 0 : index
    %20 = vector.load %arg7[%c0_15, %c0_16] : memref<1x128xf32, #tpu.memory_space<vmem>>, vector<1x128xf32>
    %21 = vector.broadcast %20 : vector<1x128xf32> to vector<16x128xf32>
    %22 = arith.addf %19, %21 : vector<16x128xf32>
    %c0_17 = arith.constant 0 : index
    %c0_18 = arith.constant 0 : index
    %23 = vector.load %arg8[%c0_17, %c0_18] : memref<16x128xf32, #tpu.memory_space<vmem>>, vector<16x128xf32>
    tpu.vector_store %arg8[%c0_17, %c0_18], %22 {strides = array<i32>} : memref<16x128xf32, #tpu.memory_space<vmem>>, vector<16x128xf32>,
    return
  }
  func.func @transform_0(%arg0: i32) -> (i32, i32) {
    %c0_i32 = arith.constant 0 : i32
    %c0_i32_0 = arith.constant 0 : i32
    return %arg0, %c0_i32 : i32, i32
  }
  func.func @transform_1(%arg0: i32) -> (i32, i32) {
    %c0_i32 = arith.constant 0 : i32
    %c0_i32_0 = arith.constant 0 : i32
    %c0_i32_1 = arith.constant 0 : i32
    return %c0_i32, %c0_i32_0 : i32, i32
  }
  func.func @transform_2(%arg0: i32) -> (i32, i32) {
    %c0_i32 = arith.constant 0 : i32
    %c0_i32_0 = arith.constant 0 : i32
    %c0_i32_1 = arith.constant 0 : i32
    return %c0_i32, %c0_i32_0 : i32, i32
  }
  func.func @transform_3(%arg0: i32) -> (i32, i32) {
    %c0_i32 = arith.constant 0 : i32
    %c0_i32_0 = arith.constant 0 : i32
    %c0_i32_1 = arith.constant 0 : i32
    return %c0_i32, %c0_i32_0 : i32, i32
  }
  func.func @transform_4(%arg0: i32) -> (i32, i32) {
    %c0_i32 = arith.constant 0 : i32
    %c0_i32_0 = arith.constant 0 : i32
    %c0_i32_1 = arith.constant 0 : i32
    return %c0_i32, %c0_i32_0 : i32, i32
  }
  func.func @transform_5(%arg0: i32) -> (i32, i32) {
    %c0_i32 = arith.constant 0 : i32
    %c0_i32_0 = arith.constant 0 : i32
    %c0_i32_1 = arith.constant 0 : i32
    return %c0_i32, %c0_i32_0 : i32, i32
  }
  func.func @transform_6(%arg0: i32) -> (i32, i32) {
    %c0_i32 = arith.constant 0 : i32
    %c0_i32_0 = arith.constant 0 : i32
    %c0_i32_1 = arith.constant 0 : i32
    return %c0_i32, %c0_i32_0 : i32, i32
  }
  func.func @transform_7(%arg0: i32) -> (i32, i32) {
    %c0_i32 = arith.constant 0 : i32
    %c0_i32_0 = arith.constant 0 : i32
    return %arg0, %c0_i32 : i32, i32
  }
}

</mosaic_0001>

<bundles_post_ra>
// kernel: mlp_forward.1
= control target key start
LH: loop header
LB: loop body
LE: loop exit
PB: predicated region body
PF: predicated region fallthrough
CT: control target
= control target key end

     0   :  { %12 = vsyncpa [#allocation3], 0  ;;  %s615_s0 = inlined_call_operand.vmem [shape: f32[16,128], index: 0, kind: input, shape index: {}]   ;;  %s616_s1 = inlined_call_operand.hbm [shape: bf16[128,128], index: 1, kind: input, shape index: {}]   ;;  %s617_s2 = inlined_call_operand.vmem [shape: f32[1,128], index: 2, kind: input, shape index: {}]   ;;  %s618_s3 = inlined_call_operand.hbm [shape: bf16[128,128], index: 3, kind: input, shape index: {}]   ;;  %s619_s4 = inlined_call_operand.vmem [shape: f32[1,128], index: 4, kind: input, shape index: {}]   ;;  %s620_s5 = inlined_call_operand.hbm [shape: bf16[128,128], index: 5, kind: input, shape index: {}]   ;;  %s621_s6 = inlined_call_operand.vmem [shape: f32[1,128], index: 6, kind: input, shape index: {}]   ;;  %s622_s7 = inlined_call_operand.vmem [shape: f32[16,128], index: 7, kind: output, shape index: {}]  }
   0x1   :  { %13 = vsyncpa [#allocation5], 0  ;;  %s35_s26 = sshll.u32 %s618_s3, 4  ;;  %s540_s27 = smov [#allocation4]   ;;  %s36_s26 = int_to_ptr.hbm [resolvable:$true] %s35_s26 }
   0x2   :  { %s37_s28 = sshll.u32 %s540_s27, 4  ;;  %s20_s8 = sshll.u32 %s616_s1, 4  ;;  %s38_s28 = int_to_ptr.vmem [resolvable:$true] %s37_s28  ;;  %s21_s8 = int_to_ptr.hbm [resolvable:$true] %s20_s8 }
   0x3   :  { %s541_s9 = smov 64   ;;  %s542_s10 = smov 4  }
   0x4   :  { %43 = dma.hbm_to_vmem [thread:$0]  %s36_s26, 1024, %s38_s28, [#allocation5], %s541_s9, %s541_s9, %s542_s10  }
   0x5   :  { %s543_s11 = smov [#allocation2]   ;;  %s50_s15 = sshll.u32 %s620_s5, 4  ;;  %s51_s15 = int_to_ptr.hbm [resolvable:$true] %s50_s15 }
   0x6   :  { %s22_s12 = sshll.u32 %s543_s11, 4  ;;  %s544_s3 = smov [#allocation6]   ;;  %s23_s12 = int_to_ptr.vmem [resolvable:$true] %s22_s12 }
   0x7   :  { %28 = dma.hbm_to_vmem [thread:$0]  %s21_s8, 1024, %s23_s12, [#allocation3], %s541_s9, %s541_s9, %s542_s10  }
   0x8   :  { %s52_s16 = sshll.u32 %s544_s3, 4  ;;  %s53_s16 = int_to_ptr.vmem [resolvable:$true] %s52_s16 }
   0x9   :  { %58 = dma.hbm_to_vmem [thread:$0]  %s51_s15, 1024, %s53_s16, [#allocation5], %s541_s9, %s541_s9, %s542_s10  }
   0xa   :  { %536 = dma.done.wait [#allocation3], 1024  }
   0xb   :  { %537 = vsyncadd [#allocation3], 4294966272 }
   0xc   :  { %538 = dma.done.wait [#allocation5], 2048  }
   0xd   :  { %539 = vsyncadd [#allocation5], 4294965248  ;;  %v439_v0 = vld [vmem:[#allocation2 + $0x38] sm:$0xff]  ;;  %v438_v1 = vld [vmem:[#allocation2 + $0x30] sm:$0xff] }
   0xe   :  { %144 = vmatpush.bf16.msra.mxu0 %v439_v0  ;;  %v447_v2 = vld [vmem:[#allocation4 + $0x38] sm:$0xff]  ;;  %v446_v3 = vld [vmem:[#allocation4 + $0x30] sm:$0xff]  ;;  %v437_v4 = vld [vmem:[#allocation2 + $0x28] sm:$0xff] }
   0xf   :  { %229 = vmatpush.bf16.msra.mxu1 %v447_v2  ;;  %v445_v5 = vld [vmem:[#allocation4 + $0x28] sm:$0xff]  ;;  %v436_v6 = vld [vmem:[#allocation2 + $0x20] sm:$0xff]  ;;  %v435_v8 = vld [vmem:[#allocation2 + $0x18] sm:$0xff] }
  0x10   :  { %v444_v7 = vld [vmem:[#allocation4 + $0x20] sm:$0xff]  ;;  %v434_v9 = vld [vmem:[#allocation2 + $0x10] sm:$0xff]  ;;  %v433_v10 = vld [vmem:[#allocation2 + $0x8] sm:$0xff] }
  0x11   :  { %v432_v11 = vld [vmem:[#allocation2] sm:$0xff]  ;;  %v74_v13 = vld [vmem:[%s615_s0 + $0x8] sm:$0xff]  ;;  %v443_v15 = vld [vmem:[#allocation4 + $0x18] sm:$0xff] }
  0x12   :  { %145 = vmatpush.bf16.msra.mxu0 %v438_v1  ;;  %v73_v12 = vld [vmem:[%s615_s0] sm:$0xff]  ;;  %v442_v16 = vld [vmem:[#allocation4 + $0x10] sm:$0xff]  ;;  %v441_v17 = vld [vmem:[#allocation4 + $0x8] sm:$0xff] }
  0x13   :  { %230 = vmatpush.bf16.msra.mxu1 %v446_v3  ;;  %v75_v14 = vpack.c.bf16 %v74_v13, %v73_v12  ;;  %v440_v18 = vld [vmem:[#allocation4] sm:$0xff]  ;;  %v455_v19 = vld [vmem:[#allocation6 + $0x38] sm:$0xff]  ;;  %v454_v20 = vld [vmem:[#allocation6 + $0x30] sm:$0xff] }
  0x14   :  { %314 = vmatpush.bf16.msra.mxu2 %v455_v19  ;;  %v453_v21 = vld [vmem:[#allocation6 + $0x28] sm:$0xff]  ;;  %v452_v22 = vld [vmem:[#allocation6 + $0x20] sm:$0xff]  ;;  %v451_v31 = vld [vmem:[#allocation6 + $0x18] sm:$0xff] }
  0x15   :  { %v461_v24 = vld [vmem:[%s617_s2] ss:$0 sm:$0xff]  ;;  %v450_v32 = vld [vmem:[#allocation6 + $0x10] sm:$0xff]  ;;  %v449_v33 = vld [vmem:[#allocation6 + $0x8] sm:$0xff] }
  0x16   :  { %146 = vmatpush.bf16.msra.mxu0 %v437_v4  ;;  %v448_v34 = vld [vmem:[#allocation6] sm:$0xff] }
  0x17   :  { %231 = vmatpush.bf16.msra.mxu1 %v445_v5  ;;  %v462_v36 = vld [vmem:[%s619_s4] ss:$0 sm:$0xff] }
  0x18   :  { %315 = vmatpush.bf16.msra.mxu2 %v454_v20  ;;  %v463_v43 = vld [vmem:[%s621_s6] ss:$0 sm:$0xff] }
  0x1a   :  { %147 = vmatpush.bf16.msra.mxu0 %v436_v6 }
  0x1b   :  { %232 = vmatpush.bf16.msra.mxu1 %v444_v7 }
  0x1c   :  { %316 = vmatpush.bf16.msra.mxu2 %v453_v21 }
  0x1e   :  { %148 = vmatpush.bf16.msra.mxu0 %v435_v8 }
  0x1f   :  { %233 = vmatpush.bf16.msra.mxu1 %v443_v15 }
  0x20   :  { %317 = vmatpush.bf16.msra.mxu2 %v452_v22 }
  0x22   :  { %149 = vmatpush.bf16.msra.mxu0 %v434_v9 }
  0x23   :  { %234 = vmatpush.bf16.msra.mxu1 %v442_v16 }
  0x24   :  { %318 = vmatpush.bf16.msra.mxu2 %v451_v31 }
  0x26   :  { %150 = vmatpush.bf16.msra.mxu0 %v433_v10 }
  0x27   :  { %235 = vmatpush.bf16.msra.mxu1 %v441_v17 }
  0x28   :  { %319 = vmatpush.bf16.msra.mxu2 %v450_v32 }
  0x2a   :  { %151 = vmatpush.bf16.msra.mxu0 %v432_v11 }
  0x2b   :  { %236 = vmatpush.bf16.msra.mxu1 %v440_v18 }
  0x2c   :  { %320 = vmatpush.bf16.msra.mxu2 %v449_v33 }
  0x2d   :  { %152 = vmatmul.bf16.vlgmr.msra.gmra.mxu0 %v75_v14 }
  0x30   :  { %321 = vmatpush.bf16.msra.mxu2 %v448_v34 }
  0xaa   :  { %v153_v23 = vpop.f32.mrf.mxu0 }
  0xab   :  { %v154_v25 = vadd.f32 %v461_v24, %v153_v23 }
  0xad   :  { %v158_v28 = vmax.f32 %v154_v25, 0.0 }
  0xb2   :  { %v155_v26 = vpop.f32.mrf.mxu0 }
  0xb3   :  { %v156_v27 = vadd.f32 %v461_v24, %v155_v26 }
  0xb5   :  { %v159_v29 = vmax.f32 %v156_v27, 0.0 }
  0xb7   :  { %v160_v30 = vpack.c.bf16 %v159_v29, %v158_v28 }
  0xb9   :  { %237 = vmatmul.bf16.vlgmr.msra.gmra.mxu1 %v160_v30 }
 0x136   :  { %v238_v35 = vpop.f32.mrf.mxu1 }
 0x137   :  { %v239_v37 = vadd.f32 %v462_v36, %v238_v35 }
 0x139   :  { %v243_v40 = vmax.f32 %v239_v37, 0.0 }
 0x13e   :  { %v240_v38 = vpop.f32.mrf.mxu1 }
 0x13f   :  { %v241_v39 = vadd.f32 %v462_v36, %v240_v38 }
 0x141   :  { %v244_v41 = vmax.f32 %v241_v39, 0.0 }
 0x143   :  { %v245_v42 = vpack.c.bf16 %v244_v41, %v243_v40 }
 0x145   :  { %322 = vmatmul.bf16.vlgmr.msra.gmra.mxu2 %v245_v42 }
 0x1c8   :  { %v323_v44 = vpop.f32.mrf.mxu2 }
 0x1c9   :  { %v324_v45 = vadd.f32 %v463_v43, %v323_v44 }
 0x1cb   :  { %328 = vst [vmem:[%s622_s7] sm:$0xff] %v324_v45 }
 0x1d0   :  { %v325_v46 = vpop.f32.mrf.mxu2 }
 0x1d1   :  { %v326_v47 = vadd.f32 %v463_v43, %v325_v46 }
 0x1d3   :  { %329 = vst [vmem:[%s622_s7 + $0x8] sm:$0xff] %v326_v47 }
 0x1d4   :  { %334 = vsyncpa [#allocation3], 1 }
 0x1d5   :  { %335 = vsyncpa [#allocation5], 1 }

</bundles_post_ra>
